<compile_context>
chip_gen: v7x
topology: tpu7x:2x2x1
jax: 0.10.0
libtpu: 0.0.40
codegen_flags: <defaults>
</compile_context>

<pallas_src>
import jax
import jax.numpy as jnp
from jax import lax
from jax.experimental import pallas as pl
from jax.experimental.pallas import tpu as pltpu

_EPS = 1e-5


def _spatial_att_kernel(x_ref, sb_ref, o_ref):
    # x_ref : (R, Lt) native dtype — all N*C rows for Lt spatial positions.
    # sb_ref: (2, Lt) f32 — row 0: w_bn*gamma, row 1: w_bn*beta (per position).
    x = x_ref[...].astype(jnp.float32)
    inv_r = 1.0 / x.shape[0]

    # Per-spatial-position batch statistics over the (N*C) rows.
    mean = jnp.sum(x, axis=0, keepdims=True) * inv_r           # (1, Lt)
    xc = x - mean                                              # centered, reused
    var = jnp.sum(xc * xc, axis=0, keepdims=True) * inv_r      # (1, Lt)

    # Fused affine: z = w_bn*(gamma*(x-mean)*rsqrt(var+eps) + beta)
    scale = sb_ref[0:1, :] * lax.rsqrt(var + _EPS)             # (1, Lt)
    z = xc * scale + sb_ref[1:2, :]

    o_ref[...] = (jax.nn.sigmoid(z) * x).astype(o_ref.dtype)   # gate * residual


def _pick_l_tile(r, l, itemsize, per_block_bytes=4 * 1024 * 1024, max_tile=2048):
    """Pick lane (spatial) tile and padded length for an (r, l) slab."""
    bytes_per_lane = r * itemsize
    if l % 128 != 0 and l * bytes_per_lane <= 2 * per_block_bytes:
        # Ragged spatial extent that fits VMEM: one full-extent lane block
        # (allowed by BlockSpec) — avoids any padding copy of x.
        return l, l
    budget_lanes = max(128, (per_block_bytes // max(bytes_per_lane, 1)) // 128 * 128)
    l_up = ((l + 127) // 128) * 128
    l_tile = min(budget_lanes, max_tile, l_up)
    # Prefer >=2 grid steps when the slab is large enough for DMA/compute
    # overlap to matter; for tiny slabs a single block has less overhead.
    if l_tile >= l_up and l_up >= 256 and l_up * bytes_per_lane > (2 << 20):
        l_tile = max(128, (l_up // 2) // 128 * 128)
    # Prefer a lane-dense tile that divides l exactly (no padding copy).
    for cand in range(l_tile, 127, -128):
        if l % cand == 0:
            return cand, l
    # Otherwise pad l up to a multiple of the tile; stats are per-column so
    # padded columns never contaminate real ones and their stores are dropped.
    return l_tile, ((l + l_tile - 1) // l_tile) * l_tile


def spatial_att(x_nchw, gamma, beta):
    """x_nchw: (N, C, H, W); gamma, beta: (H*W,) BN params. Returns (N, C, H, W)."""
    n, c, h, w = x_nchw.shape
    hw = h * w
    r = n * c

    # Free reshape of contiguous NCHW — no transpose, no extra HBM pass.
    x2d = x_nchw.reshape(r, hw)

    # Hoisted per-position weights (the |gamma| sum must stay global).
    gamma_f = gamma.reshape(hw).astype(jnp.float32)
    beta_f = beta.reshape(hw).astype(jnp.float32)
    w_bn = jnp.abs(gamma_f) / jnp.sum(jnp.abs(gamma_f))
    sb = jnp.stack([w_bn * gamma_f, w_bn * beta_f], axis=0)    # (2, hw) f32

    l_tile, l_pad = _pick_l_tile(r, hw, x2d.dtype.itemsize)
    if l_pad != hw:
        pad = l_pad - hw
        x2d = jnp.pad(x2d, ((0, 0), (0, pad)))
        sb = jnp.pad(sb, ((0, 0), (0, pad)))

    grid = (l_pad // l_tile,)

    out2d = pl.pallas_call(
        _spatial_att_kernel,
        out_shape=jax.ShapeDtypeStruct((r, l_pad), x2d.dtype),
        grid_spec=pltpu.PrefetchScalarGridSpec(
            num_scalar_prefetch=0,
            grid=grid,
            in_specs=[
                pl.BlockSpec((r, l_tile), lambda j: (0, j)),   # x slab
                pl.BlockSpec((2, l_tile), lambda j: (0, j)),   # [w_bn*gamma; w_bn*beta]
            ],
            out_specs=pl.BlockSpec((r, l_tile), lambda j: (0, j)),
        ),
        compiler_params=pltpu.CompilerParams(
            dimension_semantics=("parallel",),          # shards across TCs on v7x
            vmem_limit_bytes=48 * 1024 * 1024,          # safe on v5e/v6e/v7x
        ),
    )(x2d, sb)

    if l_pad != hw:
        out2d = out2d[:, :hw]
    return out2d.reshape(n, c, h, w)


def spatial_att_ref(x, gamma, beta):
    """Pure-JAX mirror of the PyTorch Spatial_Att.forward."""
    n, c, h, w = x.shape
    hw = h * w
    xr = jnp.transpose(x, (0, 2, 3, 1)).reshape(n, hw, 1, c)          # (b, hw, 1, c)
    mean = jnp.mean(xr, axis=(0, 2, 3), keepdims=True)
    var = jnp.mean((xr - mean) ** 2, axis=(0, 2, 3), keepdims=True)
    g = gamma.reshape(1, hw, 1, 1)
    b = beta.reshape(1, hw, 1, 1)
    x_bn = g * (xr - mean) * lax.rsqrt(var + _EPS) + b
    w_bn = jnp.abs(gamma) / jnp.sum(jnp.abs(gamma))
    x2 = jnp.transpose(x_bn, (0, 3, 2, 1))                            # (b, c, 1, hw)
    x2 = w_bn.reshape(1, 1, 1, hw) * x2
    x2 = x2.reshape(n, c, h, w)
    return jax.nn.sigmoid(x2) * x


if __name__ == "__main__":
    key = jax.random.PRNGKey(0)
    kx, kg, kb = jax.random.split(key, 3)

    N, C, H, W = 2, 4, 16, 16
    HW = H * W
    x = jax.random.normal(kx, (N, C, H, W), dtype=jnp.float32)
    # Spatial_Att's BatchNorm2d normalizes over spatial positions, so its
    # parameter length (constructor `channels`) must equal H*W.
    gamma = jax.random.normal(kg, (HW,), dtype=jnp.float32)
    beta = 0.1 * jax.random.normal(kb, (HW,), dtype=jnp.float32)

    out = jax.block_until_ready(spatial_att(x, gamma, beta))
    ref = spatial_att_ref(x, gamma, beta)

    assert out.shape == (N, C, H, W)
    assert out.dtype == x.dtype
    assert jnp.allclose(out, ref, atol=1e-5, rtol=1e-5), "mismatch vs reference"

    print("KERNEL_OK")
</pallas_src>

<mosaic_0001>
module attributes {stable_mosaic.version = 11 : i64} {
  func.func @_spatial_att_kernel(%arg0: i32, %arg1: memref<8x256xf32, #tpu.memory_space<vmem>>, %arg2: memref<2x256xf32, #tpu.memory_space<vmem>>, %arg3: memref<8x256xf32, #tpu.memory_space<vmem>>) attributes {dimension_semantics = [#tpu.dimension_semantics<parallel>], iteration_bounds = array<i64: 1>, scalar_prefetch = 0 : i64, scratch_operands = 0 : i64, tpu.core_type = #tpu.core_type<tc>, window_params = [{transform_indices = @transform_0, window_bounds = array<i64: 8, 256>}, {transform_indices = @transform_1, window_bounds = array<i64: 2, 256>}, {transform_indices = @transform_2, window_bounds = array<i64: 8, 256>}]} {
    %c0 = arith.constant 0 : index
    %c0_0 = arith.constant 0 : index
    %0 = vector.load %arg1[%c0, %c0_0] : memref<8x256xf32, #tpu.memory_space<vmem>>, vector<8x256xf32>
    %cst = arith.constant dense<0.000000e+00> : vector<256xf32>
    %1 = vector.multi_reduction <add>, %0, %cst [0] : vector<8x256xf32> to vector<256xf32>
    %2 = vector.shape_cast %1 : vector<256xf32> to vector<1x256xf32>
    %cst_1 = arith.constant 1.250000e-01 : f32
    %3 = vector.broadcast %cst_1 : f32 to vector<1x256xf32>
    %4 = arith.mulf %2, %3 : vector<1x256xf32>
    %5 = vector.broadcast %4 : vector<1x256xf32> to vector<8x256xf32>
    %6 = arith.subf %0, %5 : vector<8x256xf32>
    %7 = arith.mulf %6, %6 : vector<8x256xf32>
    %cst_2 = arith.constant dense<0.000000e+00> : vector<256xf32>
    %8 = vector.multi_reduction <add>, %7, %cst_2 [0] : vector<8x256xf32> to vector<256xf32>
    %9 = vector.shape_cast %8 : vector<256xf32> to vector<1x256xf32>
    %cst_3 = arith.constant 1.250000e-01 : f32
    %10 = vector.broadcast %cst_3 : f32 to vector<1x256xf32>
    %11 = arith.mulf %9, %10 : vector<1x256xf32>
    %c0_4 = arith.constant 0 : index
    %c0_5 = arith.constant 0 : index
    %12 = vector.load %arg2[%c0_4, %c0_5] : memref<2x256xf32, #tpu.memory_space<vmem>>, vector<1x256xf32>
    %cst_6 = arith.constant 9.99999974E-6 : f32
    %13 = vector.broadcast %cst_6 : f32 to vector<1x256xf32>
    %14 = arith.addf %11, %13 : vector<1x256xf32>
    %15 = math.rsqrt %14 : vector<1x256xf32>
    %16 = arith.mulf %12, %15 : vector<1x256xf32>
    %17 = vector.broadcast %16 : vector<1x256xf32> to vector<8x256xf32>
    %18 = arith.mulf %6, %17 : vector<8x256xf32>
    %c1 = arith.constant 1 : index
    %c0_7 = arith.constant 0 : index
    %19 = vector.load %arg2[%c1, %c0_7] : memref<2x256xf32, #tpu.memory_space<vmem>>, vector<1x256xf32>
    %20 = vector.broadcast %19 : vector<1x256xf32> to vector<8x256xf32>
    %21 = arith.addf %18, %20 : vector<8x256xf32>
    %22 = arith.negf %21 : vector<8x256xf32>
    %23 = math.exp %22 : vector<8x256xf32>
    %cst_8 = arith.constant 1.000000e+00 : f32
    %24 = vector.broadcast %cst_8 : f32 to vector<8x256xf32>
    %25 = arith.addf %24, %23 : vector<8x256xf32>
    %26 = arith.divf %24, %25 : vector<8x256xf32>
    %27 = arith.mulf %26, %0 : vector<8x256xf32>
    %c0_9 = arith.constant 0 : index
    %c0_10 = arith.constant 0 : index
    %28 = vector.load %arg3[%c0_9, %c0_10] : memref<8x256xf32, #tpu.memory_space<vmem>>, vector<8x256xf32>
    tpu.vector_store %arg3[%c0_9, %c0_10], %27 {strides = array<i32>} : memref<8x256xf32, #tpu.memory_space<vmem>>, vector<8x256xf32>,
    return
  }
  func.func @transform_0(%arg0: i32) -> (i32, i32) {
    %c0_i32 = arith.constant 0 : i32
    %c0_i32_0 = arith.constant 0 : i32
    return %c0_i32, %arg0 : i32, i32
  }
  func.func @transform_1(%arg0: i32) -> (i32, i32) {
    %c0_i32 = arith.constant 0 : i32
    %c0_i32_0 = arith.constant 0 : i32
    return %c0_i32, %arg0 : i32, i32
  }
  func.func @transform_2(%arg0: i32) -> (i32, i32) {
    %c0_i32 = arith.constant 0 : i32
    %c0_i32_0 = arith.constant 0 : i32
    return %c0_i32, %arg0 : i32, i32
  }
}

</mosaic_0001>

<bundles_post_ra>
// kernel: tpu_custom_call.1
= control target key start
LH: loop header
LB: loop body
LE: loop exit
PB: predicated region body
PF: predicated region fallthrough
CT: control target
= control target key end

     0   :  { %7 = vsyncpa [#allocation3], 0  ;;  %s311_s0 = inlined_call_operand.hbm [shape: f32[8,256], index: 0, kind: input, shape index: {}]   ;;  %s312_s1 = inlined_call_operand.hbm [shape: f32[2,256], index: 1, kind: input, shape index: {}]   ;;  %s313_s2 = inlined_call_operand.hbm [shape: f32[8,256], index: 2, kind: output, shape index: {}]  }
   0x1   :  { %8 = vsyncpa [#allocation6], 0 }
   0x2   :  { %9 = vsyncpa [#allocation4], 0  ;;  %s244_s9 = smov [#allocation2]   ;;  %s245_s11 = smov [#allocation5]  }
   0x3   :  { %s16_s10 = sshll.u32 %s244_s9, 4  ;;  %s26_s12 = sshll.u32 %s245_s11, 4  ;;  %s17_s10 = int_to_ptr.vmem [resolvable:$true] %s16_s10  ;;  %s27_s12 = int_to_ptr.vmem [resolvable:$true] %s26_s12 }
   0x4   :  { %s172_s15 = scalar_lea.hbm %s311_s0, 256 }
   0x5   :  { %p173_p0 = scmp.ne.s32.totalorder %s311_s0, %s172_s15  ;;  %p176_p1 = scmp.lt.u32.totalorder %s172_s15, %s311_s0 }
   0x7   :  { %p178_p2 = pnand %p176_p1, %p173_p0 }
   0x9   :  { %181 = shalt.err (!%p178_p2)
}
   0xa   :  { %s182_s20 = scalar_lea.vmem %s17_s10, 256  ;;  %p187_p4 = scmp.lt.s32.totalorder %s17_s10, %s17_s10 }
   0xb   :  { %p183_p3 = scmp.ne.s32.totalorder %s17_s10, %s182_s20  ;;  %p188_p5 = scmp.lt.s32.totalorder %s182_s20, %s182_s20 }
   0xd   :  { %p189_p6 = por %p188_p5, %p187_p4 }
   0xf   :  { %p190_p7 = pnand %p189_p6, %p183_p3 }
  0x11   :  { %193 = shalt.err (!%p190_p7)
}
  0x12   :  { %19 = dma.hbm_to_vmem [thread:$0]  %s311_s0, 256, %s17_s10, [#allocation3]  }
  0x13   :  { %s194_s25 = scalar_lea.hbm %s312_s1, 64 }
  0x14   :  { %p195_p8 = scmp.ne.s32.totalorder %s312_s1, %s194_s25  ;;  %p198_p9 = scmp.lt.u32.totalorder %s194_s25, %s312_s1 }
  0x16   :  { %p200_p10 = pnand %p198_p9, %p195_p8 }
  0x18   :  { %203 = shalt.err (!%p200_p10)
}
  0x19   :  { %s204_s30 = scalar_lea.vmem %s27_s12, 64  ;;  %p209_p12 = scmp.lt.s32.totalorder %s27_s12, %s27_s12 }
  0x1a   :  { %p205_p11 = scmp.ne.s32.totalorder %s27_s12, %s204_s30  ;;  %p210_p13 = scmp.lt.s32.totalorder %s204_s30, %s204_s30 }
  0x1c   :  { %p211_p0 = por %p210_p13, %p209_p12 }
  0x1e   :  { %p212_p1 = pnand %p211_p0, %p205_p11 }
  0x20   :  { %215 = shalt.err (!%p212_p1)
}
  0x21   :  { %29 = dma.hbm_to_vmem [thread:$0]  %s312_s1, 64, %s27_s12, [#allocation6]  }
  0x22   :  { %238 = dma.done.wait [#allocation3], 256  }
  0x23   :  { %239 = vsyncadd [#allocation3], 4294967040 }
  0x24   :  { %240 = dma.done.wait [#allocation6], 64  }
  0x25   :  { %241 = vsyncadd [#allocation6], 4294967232  ;;  %v287_v0 = vld [vmem:[#allocation2] sm:$0xff]  ;;  %v289_v1 = vld [vmem:[#allocation2 + $0x8] sm:$0xff]  ;;  %v246_v36 = vmov 1966171168   ;;  %v81_v38 = vlaneseq }
  0x26   :  { %v38_v2 = vrot.slane %v287_v0, 4  ;;  %v44_v3 = vrot.slane %v289_v1, 4  ;;  %v79_v37 = vunpack.c.l.s4 %v246_v36  ;;  %v70_v46 = vld [vmem:[#allocation5] ss:$2 sm:$0x3]  ;;  %s247_s1 = smov [#allocation7]  }
  0x27   :  { %v82_v40 = vshrl.u32 %v81_v38, 7  ;;  %v108_v50 = vld [vmem:[#allocation5 + $0x1] ss:$2 sm:$0x3]  ;;  %s144_s4 = sshll.u32 %s247_s1, 4  ;;  %s145_s4 = int_to_ptr.vmem [resolvable:$true] %s144_s4 }
  0x28   :  { %v39_v4 = vadd.f32 %v38_v2, %v287_v0  ;;  %v45_v5 = vadd.f32 %v44_v3, %v289_v1  ;;  %v80_v39 = vunpack.c.0.s8 %v79_v37  ;;  %s216_s5 = scalar_lea.vmem %s145_s4, 256  ;;  %p221_p3 = scmp.lt.s32.totalorder %s145_s4, %s145_s4 }
  0x29   :  { %v97_v48 = vsub.s32 0, %v82_v40  ;;  %v101_v49 = vsub.s32 1, %v82_v40  ;;  %p217_p2 = scmp.ne.s32.totalorder %s145_s4, %s216_s5  ;;  %p222_p4 = scmp.lt.s32.totalorder %s216_s5, %s216_s5 }
  0x2a   :  { %v40_v6 = vrot.slane %v39_v4, 2  ;;  %v46_v7 = vrot.slane %v45_v5, 2  ;;  %v83_v42 = vsub.s32 %v80_v39, %v82_v40 }
  0x2b   :  { %v113_v54 = vrot.slane %v108_v50, %v97_v48  ;;  %v117_v55 = vrot.slane %v108_v50, %v101_v49  ;;  %p223_p5 = por %p222_p4, %p221_p3 }
  0x2c   :  { %v41_v8 = vadd.f32 %v40_v6, %v39_v4  ;;  %v47_v9 = vadd.f32 %v46_v7, %v45_v5 }
  0x2d   :  { %p224_p6 = pnand %p223_p5, %p217_p2 }
  0x2e   :  { %v42_v10 = vrot.slane %v41_v8, 1  ;;  %v48_v11 = vrot.slane %v47_v9, 1 }
  0x30   :  { %v43_v12 = vadd.f32 %v42_v10, %v41_v8  ;;  %v49_v13 = vadd.f32 %v48_v11, %v47_v9 }
  0x32   :  { %v50_v14 = vmul.f32 0.125, %v43_v12  ;;  %v51_v15 = vmul.f32 0.125, %v49_v13 }
  0x34   :  { %v52_v16 = vsub.f32 %v287_v0, %v50_v14  ;;  %v53_v17 = vsub.f32 %v289_v1, %v51_v15 }
  0x36   :  { %v54_v18 = vmul.f32 %v52_v16, %v52_v16  ;;  %v55_v19 = vmul.f32 %v53_v17, %v53_v17 }
  0x38   :  { %v56_v20 = vrot.slane %v54_v18, 4  ;;  %v62_v21 = vrot.slane %v55_v19, 4 }
  0x3a   :  { %v57_v22 = vadd.f32 %v56_v20, %v54_v18  ;;  %v63_v23 = vadd.f32 %v62_v21, %v55_v19 }
  0x3c   :  { %v58_v24 = vrot.slane %v57_v22, 2  ;;  %v64_v25 = vrot.slane %v63_v23, 2 }
  0x3e   :  { %v59_v26 = vadd.f32 %v58_v24, %v57_v22  ;;  %v65_v27 = vadd.f32 %v64_v25, %v63_v23 }
  0x40   :  { %v60_v28 = vrot.slane %v59_v26, 1  ;;  %v66_v29 = vrot.slane %v65_v27, 1 }
  0x42   :  { %v61_v30 = vadd.f32 %v60_v28, %v59_v26  ;;  %v67_v31 = vadd.f32 %v66_v29, %v65_v27 }
  0x44   :  { %v68_v32 = vmul.f32 0.125, %v61_v30  ;;  %v69_v33 = vmul.f32 0.125, %v67_v31 }
  0x46   :  { %v71_v34 = vadd.f32 1e-05, %v68_v32  ;;  %v72_v35 = vadd.f32 1e-05, %v69_v33 }
  0x48   :  { %160 = vrsqrt.f32 %v71_v34 }
  0x49   :  { %162 = vrsqrt.f32 %v72_v35 }
  0x52   :  { %v161_v41 = vpop.eup %160 }
  0x53   :  { %v163_v43 = vpop.eup %162 }
  0x54   :  { %v77_v44 = vcombine.low %v161_v41, %v163_v43 }
  0x56   :  { %v84_v45 = vrot.slane %v77_v44, %v83_v42 }
  0x58   :  { %v91_v47 = vrot.slane %v84_v45, %v83_v42 }
  0x5a   :  { %v93_v51 = vmul.f32 %v91_v47, %v70_v46 }
  0x5c   :  { %v98_v52 = vrot.slane %v93_v51, %v97_v48  ;;  %v102_v53 = vrot.slane %v93_v51, %v101_v49 }
  0x5e   :  { %v105_v56 = vmul.f32 %v98_v52, %v52_v16  ;;  %v106_v57 = vmul.f32 %v102_v53, %v53_v17 }
  0x60   :  { %v120_v58 = vadd.f32 %v113_v54, %v105_v56  ;;  %v121_v59 = vadd.f32 %v117_v55, %v106_v57 }
  0x62   :  { %v154_v60 = vmul.f32 -1.442695, %v120_v58  ;;  %v155_v61 = vmul.f32 -1.442695, %v121_v59 }
  0x64   :  { %164 = vpow2.f32 %v154_v60 }
  0x65   :  { %166 = vpow2.f32 %v155_v61 }
  0x6e   :  { %v165_v62 = vpop.eup %164 }
  0x6f   :  { %v167_v63 = vpop.eup %166  ;;  %v128_v2 = vadd.f32 1.0, %v165_v62 }
  0x70   :  { %v129_v3 = vadd.f32 1.0, %v167_v63 }
  0x71   :  { %168 = vrcp.f32 %v128_v2 }
  0x72   :  { %170 = vrcp.f32 %v129_v3 }
  0x7b   :  { %v169_v4 = vpop.eup %168 }
  0x7c   :  { %v171_v5 = vpop.eup %170  ;;  %v134_v6 = vmul.f32 %v169_v4, %v287_v0 }
  0x7d   :  { %v135_v7 = vmul.f32 %v171_v5, %v289_v1 }
  0x7e   :  { %136 = vst [vmem:[#allocation7] sm:$0xff] %v134_v6 }
  0x7f   :  { %137 = vst [vmem:[#allocation7 + $0x8] sm:$0xff] %v135_v7 }
  0x80   :  { %227 = shalt.err (!%p224_p6)
}
  0x81   :  { %s228_s8 = scalar_lea.hbm %s313_s2, 256 }
  0x82   :  { %p229_p7 = scmp.ne.s32.totalorder %s313_s2, %s228_s8  ;;  %p232_p8 = scmp.lt.u32.totalorder %s228_s8, %s313_s2 }
  0x84   :  { %p234_p9 = pnand %p232_p8, %p229_p7 }
  0x86   :  { %237 = shalt.err (!%p234_p9)
}
  0x87   :  { %147 = dma.vmem_to_hbm [thread:$0]  %s145_s4, 256, %s313_s2, [#allocation4]  }
  0x88   :  { %242 = dma.done.wait [#allocation4], 256  }
  0x89   :  { %243 = vsyncadd [#allocation4], 4294967040 }
  0x8a   :  { %151 = vsyncpa [#allocation3], 1 }
  0x8b   :  { %152 = vsyncpa [#allocation6], 1 }
  0x8c   :  { %153 = vsyncpa [#allocation4], 1 }

</bundles_post_ra>
